<compile_context>
chip_gen: v7x
topology: tpu7x:2x2x1
jax: 0.10.0
libtpu: 0.0.40
codegen_flags: <defaults>
</compile_context>

<pallas_src>
import functools

import jax
import jax.numpy as jnp
from jax.experimental import pallas as pl
from jax.experimental.pallas import tpu as pltpu

CLASS_PAD = 128  # lane-dense padded class width


# ----------------------------------------------------------------------------
# Fused kernel: conv1 + ReLU + (dropout as identity) + conv2 + log_softmax
# ----------------------------------------------------------------------------
def _p1gcn_fused_kernel(a_ref, x_ref, w1_ref, w2_ref, b_ref, o_ref, *, hidden):
    a = a_ref[...]            # (N, N)  bf16, row-normalized adjacency (no self loops)
    x = x_ref[...]            # (N, F)  bf16
    bias = b_ref[...]         # (2, CLASS_PAD) f32
    b1 = bias[0:1, :hidden]   # (1, H)
    b2 = bias[1:2, :]         # (1, CLASS_PAD); padded lanes already hold -1e30

    # ---- Layer 1: one wide MXU call  y = x @ [W1_self | W1_agg] -------------
    y = jnp.dot(x, w1_ref[...], preferred_element_type=jnp.float32)    # (N, 2H) f32
    h = (y[:, :hidden]
         + jnp.dot(a, y[:, hidden:].astype(jnp.bfloat16),
                   preferred_element_type=jnp.float32)
         + b1)
    h = jnp.maximum(h, 0.0)   # ReLU in f32

    # TODO(synk): ptens Dropout(p=0.5) is applied as identity (eval mode);
    # training-mode stochastic masking is not reproduced here.

    # ---- Layer 2: aggregate first (narrow N x H contraction), then one wide
    #      MXU call  z = [h | A@h] @ [[W2_self], [W2_agg]] + b2 ----------------
    hb = h.astype(jnp.bfloat16)
    ah = jnp.dot(a, hb, preferred_element_type=jnp.float32)             # (N, H) f32
    hcat = jnp.concatenate([hb, ah.astype(jnp.bfloat16)], axis=1)       # (N, 2H) bf16
    z = jnp.dot(hcat, w2_ref[...], preferred_element_type=jnp.float32) + b2
    # Padded class lanes are exactly -1e30 (zero W2 pad columns + bias mask).

    # ---- log_softmax over classes (f32; padded lanes exp-underflow to 0) ----
    m = jnp.max(z, axis=-1, keepdims=True)
    s = z - m
    lse = jnp.log(jnp.sum(jnp.exp(s), axis=-1, keepdims=True))
    o_ref[...] = (s - lse).astype(o_ref.dtype)


# ----------------------------------------------------------------------------
# Wrapper: returns the lane-dense padded (N, CLASS_PAD) slab.  Columns
# >= num_classes hold ~-1e30 and must never be reduced over downstream.
# ----------------------------------------------------------------------------
def p1gcn_forward(x, a_norm, prep, *, hidden):
    n = x.shape[0]
    kernel = functools.partial(_p1gcn_fused_kernel, hidden=hidden)
    vmem = pl.BlockSpec(memory_space=pltpu.MemorySpace.VMEM)
    return pl.pallas_call(
        kernel,
        out_shape=jax.ShapeDtypeStruct((n, CLASS_PAD), jnp.float32),
        in_specs=[vmem] * 5,
        out_specs=vmem,
    )(a_norm.astype(jnp.bfloat16), x.astype(jnp.bfloat16),
      prep["w1cat"], prep["w2cat"], prep["bias"])


# ----------------------------------------------------------------------------
# One-time parameter preprocessing: weight fusion, class padding, bias packing
# ----------------------------------------------------------------------------
def prepare_params(params, num_classes, class_pad=CLASS_PAD):
    w1, b1 = params["w1"], params["b1"]
    w2, b2 = params["w2"], params["b2"]
    f_in = w1.shape[0] // 2
    hidden = w1.shape[1]
    assert w2.shape[0] == 2 * hidden and w2.shape[1] == num_classes
    assert num_classes <= class_pad and hidden <= class_pad

    # Layer 1 slab (F, 2H):  y = x @ [W_self | W_agg]
    w1cat = jnp.concatenate([w1[:f_in], w1[f_in:]], axis=1).astype(jnp.bfloat16)

    # Layer 2 slab (2H, class_pad):  z = [h | A@h] @ [[W_self], [W_agg]]
    w2cat = jnp.zeros((2 * hidden, class_pad), jnp.float32).at[:, :num_classes].set(w2)
    w2cat = w2cat.astype(jnp.bfloat16)

    # Bias slab (2, class_pad): row 0 = b1 (zero-padded), row 1 = b2 with the
    # class-pad mask folded in (-1e30 on padded lanes; kept in f32).
    bias = jnp.zeros((2, class_pad), jnp.float32)
    bias = bias.at[0, :hidden].set(b1)
    bias = bias.at[1, :].set(jnp.full((class_pad,), -1e30, jnp.float32))
    bias = bias.at[1, :num_classes].set(b2)

    return {"w1cat": w1cat, "w2cat": w2cat, "bias": bias}


# ----------------------------------------------------------------------------
# Glue: deterministic graph / params
# ----------------------------------------------------------------------------
def build_graph(key, n, num_edges, reduction_type="mean"):
    ks, kd = jax.random.split(key)
    src = jax.random.randint(ks, (num_edges,), 0, n)
    dst = jax.random.randint(kd, (num_edges,), 0, n)
    a = jnp.zeros((n, n), jnp.float32).at[src, dst].set(1.0)
    a = jnp.clip(a + a.T, 0.0, 1.0)                    # undirected, no multi-edges
    a = a * (1.0 - jnp.eye(n, dtype=jnp.float32))      # self term handled explicitly
    if reduction_type == "mean":
        deg = jnp.maximum(jnp.sum(a, axis=1, keepdims=True), 1.0)
        a = a / deg
    edge_index = jnp.stack([src, dst], axis=0)
    return a, edge_index


def init_params(key, num_features, hidden, num_classes):
    k1, k2, k3, k4 = jax.random.split(key, 4)
    w1 = jax.random.normal(k1, (2 * num_features, hidden), jnp.float32)
    w1 = w1 / jnp.sqrt(2.0 * num_features)
    b1 = 0.01 * jax.random.normal(k2, (hidden,), jnp.float32)
    w2 = jax.random.normal(k3, (2 * hidden, num_classes), jnp.float32)
    w2 = w2 / jnp.sqrt(2.0 * hidden)
    b2 = 0.01 * jax.random.normal(k4, (num_classes,), jnp.float32)
    return {"w1": w1, "b1": b1, "w2": w2, "b2": b2}


# ----------------------------------------------------------------------------
# Pure-JAX references
# ----------------------------------------------------------------------------
def ref_forward_f32(x, a, p):
    f_in = p["w1"].shape[0] // 2
    h = x @ p["w1"][:f_in] + (a @ x) @ p["w1"][f_in:] + p["b1"]
    h = jnp.maximum(h, 0.0)
    hid = p["w2"].shape[0] // 2
    z = h @ p["w2"][:hid] + (a @ h) @ p["w2"][hid:] + p["b2"]
    return jax.nn.log_softmax(z, axis=-1)


def ref_forward_bf16(x, a, prep, hidden, num_classes):
    # Mirrors the kernel's bf16-in / f32-acc math exactly.
    xb = x.astype(jnp.bfloat16)
    ab = a.astype(jnp.bfloat16)
    bias = prep["bias"]
    y = jnp.dot(xb, prep["w1cat"], preferred_element_type=jnp.float32)
    h = (y[:, :hidden]
         + jnp.dot(ab, y[:, hidden:].astype(jnp.bfloat16),
                   preferred_element_type=jnp.float32)
         + bias[0:1, :hidden])
    h = jnp.maximum(h, 0.0)
    hb = h.astype(jnp.bfloat16)
    ah = jnp.dot(ab, hb, preferred_element_type=jnp.float32)
    z = jnp.dot(jnp.concatenate([hb, ah.astype(jnp.bfloat16)], axis=1),
                prep["w2cat"], preferred_element_type=jnp.float32) + bias[1:2, :]
    return jax.nn.log_softmax(z[:, :num_classes], axis=-1)


if __name__ == "__main__":
    # Small, CiteSeer-like shapes: N nodes, F input features, H hidden, C classes.
    N, F_IN, HIDDEN, NUM_CLASSES, NUM_EDGES = 64, 128, 64, 6, 256

    root = jax.random.PRNGKey(0)
    kx, kg, kp = jax.random.split(root, 3)

    x = jax.random.uniform(kx, (N, F_IN), jnp.float32)
    x = x / jnp.maximum(jnp.sum(x, axis=1, keepdims=True), 1e-12)  # NormalizeFeatures

    a_norm, edge_index = build_graph(kg, N, NUM_EDGES, reduction_type="mean")
    params = init_params(kp, F_IN, HIDDEN, NUM_CLASSES)
    prep = prepare_params(params, NUM_CLASSES)          # one-time preprocessing

    fwd = jax.jit(functools.partial(p1gcn_forward, hidden=HIDDEN))
    out_pad = fwd(x, a_norm, prep)
    out_pad = jax.block_until_ready(out_pad)
    assert out_pad.shape == (N, CLASS_PAD)

    # Single slice at the very end of the pipeline (outside the jitted forward).
    out = out_pad[:, :NUM_CLASSES]
    assert out.shape == (N, NUM_CLASSES)

    # log_softmax rows should exponentiate-sum to 1 over the real classes.
    assert jnp.allclose(jnp.sum(jnp.exp(out), axis=1), 1.0, atol=1e-4)

    # Exact-math check against a pure-JAX reference using the same bf16 casts.
    ref_b = ref_forward_bf16(x, a_norm, prep, HIDDEN, NUM_CLASSES)
    assert jnp.allclose(out, ref_b, atol=2e-4, rtol=2e-4)

    # Semantics check against the full-f32 reference (bf16 MXU inputs => looser tol).
    ref_f = ref_forward_f32(x, a_norm, params)
    assert jnp.allclose(out, ref_f, atol=5e-3, rtol=5e-3)

    print("KERNEL_OK")
</pallas_src>

<mosaic_0001>
module attributes {stable_mosaic.version = 11 : i64} {
  func.func @_p1gcn_fused_kernel(%arg0: memref<64x64xbf16, #tpu.memory_space<vmem>>, %arg1: memref<64x128xbf16, #tpu.memory_space<vmem>>, %arg2: memref<128x128xbf16, #tpu.memory_space<vmem>>, %arg3: memref<128x128xbf16, #tpu.memory_space<vmem>>, %arg4: memref<2x128xf32, #tpu.memory_space<vmem>>, %arg5: memref<64x128xf32, #tpu.memory_space<vmem>>) attributes {dimension_semantics = [], scalar_prefetch = 0 : i64, scratch_operands = 0 : i64, tpu.core_type = #tpu.core_type<tc>} {
    %c0 = arith.constant 0 : index
    %c0_0 = arith.constant 0 : index
    %0 = vector.load %arg0[%c0, %c0_0] : memref<64x64xbf16, #tpu.memory_space<vmem>>, vector<64x64xbf16>
    %c0_1 = arith.constant 0 : index
    %c0_2 = arith.constant 0 : index
    %1 = vector.load %arg1[%c0_1, %c0_2] : memref<64x128xbf16, #tpu.memory_space<vmem>>, vector<64x128xbf16>
    %c0_3 = arith.constant 0 : index
    %c0_4 = arith.constant 0 : index
    %2 = vector.load %arg4[%c0_3, %c0_4] : memref<2x128xf32, #tpu.memory_space<vmem>>, vector<2x128xf32>
    %3 = vector.extract_strided_slice %2 {offsets = [0, 0], sizes = [1, 64], strides = [1, 1]} : vector<2x128xf32> to vector<1x64xf32>
    %4 = vector.extract_strided_slice %2 {offsets = [1, 0], sizes = [1, 128], strides = [1, 1]} : vector<2x128xf32> to vector<1x128xf32>
    %c0_5 = arith.constant 0 : index
    %c0_6 = arith.constant 0 : index
    %5 = vector.load %arg2[%c0_5, %c0_6] : memref<128x128xbf16, #tpu.memory_space<vmem>>, vector<128x128xbf16>
    %cst = arith.constant dense<0.000000e+00> : vector<64x128xf32>
    %6 = tpu.matmul %1, %5, %cst {dimension_numbers = #tpu.dot_dimension_numbers<[1], [0], [0], [1], [0, 0, 1, 1], [], []>} : vector<64x128xbf16>, vector<128x128xbf16>, vector<64x128xf32> -> vector<64x128xf32>
    %7 = vector.extract_strided_slice %6 {offsets = [0, 0], sizes = [64, 64], strides = [1, 1]} : vector<64x128xf32> to vector<64x64xf32>
    %8 = vector.extract_strided_slice %6 {offsets = [0, 64], sizes = [64, 64], strides = [1, 1]} : vector<64x128xf32> to vector<64x64xf32>
    %9 = arith.truncf %8 : vector<64x64xf32> to vector<64x64xbf16>
    %cst_7 = arith.constant dense<0.000000e+00> : vector<64x64xf32>
    %10 = tpu.matmul %0, %9, %cst_7 {dimension_numbers = #tpu.dot_dimension_numbers<[1], [0], [0], [1], [0, 0, 1, 1], [], []>} : vector<64x64xbf16>, vector<64x64xbf16>, vector<64x64xf32> -> vector<64x64xf32>
    %11 = arith.addf %7, %10 : vector<64x64xf32>
    %12 = vector.broadcast %3 : vector<1x64xf32> to vector<64x64xf32>
    %13 = arith.addf %11, %12 : vector<64x64xf32>
    %cst_8 = arith.constant 0.000000e+00 : f32
    %14 = vector.broadcast %cst_8 : f32 to vector<64x64xf32>
    %15 = arith.maximumf %13, %14 : vector<64x64xf32>
    %16 = arith.truncf %15 : vector<64x64xf32> to vector<64x64xbf16>
    %cst_9 = arith.constant dense<0.000000e+00> : vector<64x64xf32>
    %17 = tpu.matmul %0, %16, %cst_9 {dimension_numbers = #tpu.dot_dimension_numbers<[1], [0], [0], [1], [0, 0, 1, 1], [], []>} : vector<64x64xbf16>, vector<64x64xbf16>, vector<64x64xf32> -> vector<64x64xf32>
    %18 = arith.truncf %17 : vector<64x64xf32> to vector<64x64xbf16>
    %19 = tpu.concatenate %16, %18 in 1 : vector<64x64xbf16>, vector<64x64xbf16> -> vector<64x128xbf16>
    %c0_10 = arith.constant 0 : index
    %c0_11 = arith.constant 0 : index
    %20 = vector.load %arg3[%c0_10, %c0_11] : memref<128x128xbf16, #tpu.memory_space<vmem>>, vector<128x128xbf16>
    %cst_12 = arith.constant dense<0.000000e+00> : vector<64x128xf32>
    %21 = tpu.matmul %19, %20, %cst_12 {dimension_numbers = #tpu.dot_dimension_numbers<[1], [0], [0], [1], [0, 0, 1, 1], [], []>} : vector<64x128xbf16>, vector<128x128xbf16>, vector<64x128xf32> -> vector<64x128xf32>
    %22 = vector.broadcast %4 : vector<1x128xf32> to vector<64x128xf32>
    %23 = arith.addf %21, %22 : vector<64x128xf32>
    %cst_13 = arith.constant dense<0xFF800000> : vector<64xf32>
    %24 = vector.multi_reduction <maximumf>, %23, %cst_13 [1] : vector<64x128xf32> to vector<64xf32>
    %25 = vector.shape_cast %24 : vector<64xf32> to vector<64x1xf32>
    %26 = vector.broadcast %25 : vector<64x1xf32> to vector<64x128xf32>
    %27 = arith.subf %23, %26 : vector<64x128xf32>
    %28 = math.exp %27 : vector<64x128xf32>
    %cst_14 = arith.constant dense<0.000000e+00> : vector<64xf32>
    %29 = vector.multi_reduction <add>, %28, %cst_14 [1] : vector<64x128xf32> to vector<64xf32>
    %30 = vector.shape_cast %29 : vector<64xf32> to vector<64x1xf32>
    %31 = math.log %30 : vector<64x1xf32>
    %32 = vector.broadcast %31 : vector<64x1xf32> to vector<64x128xf32>
    %33 = arith.subf %27, %32 : vector<64x128xf32>
    %c0_15 = arith.constant 0 : index
    %c0_16 = arith.constant 0 : index
    %34 = vector.load %arg5[%c0_15, %c0_16] : memref<64x128xf32, #tpu.memory_space<vmem>>, vector<64x128xf32>
    tpu.vector_store %arg5[%c0_15, %c0_16], %33 {strides = array<i32>} : memref<64x128xf32, #tpu.memory_space<vmem>>, vector<64x128xf32>,
    return
  }
}

</mosaic_0001>

<bundles_post_ra>
// kernel: p1gcn_forward.1
= control target key start
LH: loop header
LB: loop body
LE: loop exit
PB: predicated region body
PF: predicated region fallthrough
CT: control target
= control target key end

     0   :  { %s1129_s0 = inlined_call_operand.vmem [shape: bf16[64,64], index: 0, kind: input, shape index: {}]   ;;  %s1130_s1 = inlined_call_operand.vmem [shape: bf16[64,128], index: 1, kind: input, shape index: {}]   ;;  %s1131_s2 = inlined_call_operand.vmem [shape: bf16[128,128], index: 2, kind: input, shape index: {}]   ;;  %s1132_s3 = inlined_call_operand.vmem [shape: bf16[128,128], index: 3, kind: input, shape index: {}]   ;;  %s1133_s4 = inlined_call_operand.vmem [shape: f32[2,128], index: 4, kind: input, shape index: {}]   ;;  %s1134_s5 = inlined_call_operand.hbm [shape: f32[64,128], index: 5, kind: output, shape index: {}]  }
   0x1   :  { %v848_v0 = vld [vmem:[%s1131_s2] sm:$0xff]   ;;  %v849_v1 = vld [vmem:[%s1131_s2 + $0x8] sm:$0xff]   ;;  %v850_v2 = vld [vmem:[%s1131_s2 + $0x10] sm:$0xff]  }
   0x2   :  { %748 = vmatprep.subr.bf16.mxu0 %v848_v0  ;;  %v851_v3 = vld [vmem:[%s1131_s2 + $0x18] sm:$0xff]   ;;  %v856_v4 = vld [vmem:[%s1130_s1] sm:$0xff]   ;;  %v853_v6 = vld [vmem:[%s1131_s2 + $0x28] sm:$0xff]  }
   0x3   :  { %749 = vmatpush3.bf16.msra.mxu0 %v848_v0  ;;  %764 = vmatprep.mubr.bf16.mxu0 %v856_v4  ;;  %v852_v5 = vld [vmem:[%s1131_s2 + $0x20] sm:$0xff]   ;;  %v854_v7 = vld [vmem:[%s1131_s2 + $0x30] sm:$0xff]  }
   0x4   :  { %750 = vmatprep.subr.bf16.mxu0 %v849_v1 }
   0x7   :  { %751 = vmatpush3.bf16.msra.mxu0 %v849_v1 }
   0x8   :  { %752 = vmatprep.subr.bf16.mxu0 %v850_v2 }
   0xb   :  { %753 = vmatpush3.bf16.msra.mxu0 %v850_v2 }
   0xc   :  { %754 = vmatprep.subr.bf16.mxu0 %v851_v3 }
   0xf   :  { %755 = vmatpush3.bf16.msra.mxu0 %v851_v3 }
  0x10   :  { %756 = vmatprep.subr.bf16.mxu0 %v852_v5 }
  0x13   :  { %757 = vmatpush3.bf16.msra.mxu0 %v852_v5 }
  0x14   :  { %758 = vmatprep.subr.bf16.mxu0 %v853_v6 }
  0x15   :  { %10 = vsyncpa [#allocation3], 0  ;;  %v855_v8 = vld [vmem:[%s1131_s2 + $0x38] sm:$0xff]   ;;  %v857_v9 = vld [vmem:[%s1130_s1 + $0x8] sm:$0xff]   ;;  %s928_s2 = smov 64   ;;  %vm232_vm0 = vcmask 523264   ;;  %v318_v32 = vlaneseq }
  0x16   :  { %v858_v10 = vld [vmem:[%s1130_s1 + $0x10] sm:$0xff]   ;;  %v859_v11 = vld [vmem:[%s1130_s1 + $0x18] sm:$0xff]   ;;  %v860_v18 = vld [vmem:[%s1129_s0] sm:$0xff]  }
  0x17   :  { %759 = vmatpush3.bf16.msra.mxu0 %v853_v6  ;;  %780 = vmatprep.mubr.msk.bf16.mxu1 %vm232_vm0, %v860_v18  ;;  %v861_v29 = vld [vmem:[%s1129_s0 + $0x8] sm:$0xff]   ;;  %v862_v30 = vld [vmem:[%s1129_s0 + $0x10] sm:$0xff]   ;;  %v863_v31 = vld [vmem:[%s1129_s0 + $0x18] sm:$0xff]   ;;  %v1019_v33 = vshrl.u32 %v318_v32, 7 }
  0x18   :  { %760 = vmatprep.subr.bf16.mxu0 %v854_v7  ;;  %v1025_v35 = vld [vmem:[%s1133_s4] sm:$0x3] }
  0x19   :  { %v320_v34 = vsub.s32 0, %v1019_v33 }
  0x1b   :  { %761 = vmatpush3.bf16.msra.mxu0 %v854_v7  ;;  %v321_v36 = vrot.slane %v1025_v35, %v320_v34 }
  0x1c   :  { %762 = vmatprep.subr.bf16.mxu0 %v855_v8 }
  0x1f   :  { %763 = vmatpush3.bf16.msra.mxu0 %v855_v8 }
  0x22   :  { %765 = vmatmul.mubr.bf16.vlgmr.msra.gmra.mrb[0].mxu0 %v857_v9  ;;  %v864_v9 = vld [vmem:[%s1132_s3] sm:$0xff]  }
  0x23   :  { %768 = vmatprep.mubr.bf16.mxu0 %v858_v10  ;;  %v865_v10 = vld [vmem:[%s1132_s3 + $0x8] sm:$0xff]   ;;  %804 = vmatprep.subr.bf16.mxu0 %v864_v9 }
  0x24   :  { %805 = vmatpush3.bf16.msra.mxu0 %v864_v9 }
  0x25   :  { %806 = vmatprep.subr.bf16.mxu0 %v865_v10 }
  0x28   :  { %807 = vmatpush3.bf16.msra.mxu0 %v865_v10 }
  0x2a   :  { %769 = vmatmul.mubr.bf16.gmra.mrb[4].mxu0 %v859_v11  ;;  %v866_v11 = vld [vmem:[%s1132_s3 + $0x10] sm:$0xff]  }
  0x2b   :  { %808 = vmatprep.subr.bf16.mxu0 %v866_v11 }
  0x2c   :  { %809 = vmatpush3.bf16.msra.mxu0 %v866_v11 }
  0xf5   :  { %v766_v12 = vpop.f32.mrb[0].mxu0 }
  0xf6   :  { %v161_v13 = vpop.f32.mrb[1].mxu0 }
  0xf7   :  { %v767_v14 = vpop.f32.mrb[2].mxu0 }
  0xf8   :  { %v193_v15 = vpack.c.bf16 %v767_v14, %v766_v12  ;;  %v164_v16 = vpop.f32.mrb[3].mxu0 }
  0xf9   :  { %v192_v17 = vpack.c.bf16 %v164_v16, %v161_v13 }
  0xfb   :  { %220 = vrot.lane.b32.xlu0 %v192_v17, %s928_s2 }
  0xfd   :  { %v770_v19 = vpop.f32.mrb[4].mxu0 }
  0xfe   :  { %v177_v20 = vpop.f32.mrb[5].mxu0 }
  0xff   :  { %222 = vrot.lane.b32.xlu0 %v193_v15, %s928_s2  ;;  %v771_v21 = vpop.f32.mrb[6].mxu0  ;;  %v870_v15 = vld [vmem:[%s1132_s3 + $0x30] sm:$0xff]  }
 0x100   :  { %v195_v22 = vpack.c.bf16 %v771_v21, %v770_v19  ;;  %v180_v23 = vpop.f32.mrb[7].mxu0 }
 0x101   :  { %v194_v24 = vpack.c.bf16 %v180_v23, %v177_v20 }
 0x103   :  { %224 = vrot.lane.b32.xlu1 %v194_v24, %s928_s2 }
 0x107   :  { %226 = vrot.lane.b32.xlu1 %v195_v22, %s928_s2 }
 0x16d   :  { %v221_v25 = vpop.permute.xlu0 %220 }
 0x16e   :  { %772 = vmatprep.subr.bf16.mxu1 %v221_v25 }
 0x16f   :  { %773 = vmatpush3.bf16.msra.mxu1 %v221_v25 }
 0x171   :  { %v223_v26 = vpop.permute.xlu0 %222 }
 0x172   :  { %774 = vmatprep.subr.bf16.mxu1 %v223_v26 }
 0x173   :  { %775 = vmatpush3.bf16.msra.mxu1 %v223_v26 }
 0x175   :  { %v225_v27 = vpop.permute.xlu1 %224 }
 0x176   :  { %776 = vmatprep.subr.bf16.mxu1 %v225_v27 }
 0x177   :  { %777 = vmatpush3.bf16.msra.mxu1 %v225_v27 }
 0x179   :  { %v227_v28 = vpop.permute.xlu1 %226 }
 0x17a   :  { %778 = vmatprep.subr.bf16.mxu1 %v227_v28 }
 0x17b   :  { %779 = vmatpush3.bf16.msra.mxu1 %v227_v28 }
 0x17e   :  { %781 = vmatmul.mubr.msk.bf16.vlgmr.msra.gmra.mrb[0].mxu1 %vm232_vm0, %v861_v29 }
 0x17f   :  { %784 = vmatprep.mubr.msk.bf16.mxu1 %vm232_vm0, %v862_v30 }
 0x186   :  { %785 = vmatmul.mubr.msk.bf16.gmra.mrb[4].mxu1 %vm232_vm0, %v863_v31 }
 0x187   :  { %796 = vmatprep.mubr.msk.bf16.mxu1 %vm232_vm0, %v860_v18 }
 0x251   :  { %v782_v37 = vpop.f32.mrb[0].mxu1 }
 0x252   :  { %v312_v38 = vadd.f32 %v782_v37, %v766_v12  ;;  %v279_v39 = vpop.f32.mrb[1].mxu1  ;;  %v867_v12 = vld [vmem:[%s1132_s3 + $0x18] sm:$0xff]  }
 0x253   :  { %v310_v40 = vadd.f32 %v279_v39, %v161_v13  ;;  %v783_v41 = vpop.f32.mrb[2].mxu1  ;;  %810 = vmatprep.subr.bf16.mxu0 %v867_v12  ;;  %v868_v13 = vld [vmem:[%s1132_s3 + $0x20] sm:$0xff]   ;;  %v457_v39 = vsub.s32 1, %v1019_v33 }
 0x254   :  { %v324_v42 = vadd.f32 %v321_v36, %v312_v38  ;;  %v313_v43 = vadd.f32 %v783_v41, %v767_v14  ;;  %v282_v44 = vpop.f32.mrb[3].mxu1  ;;  %811 = vmatpush3.bf16.msra.mxu0 %v867_v12  ;;  %v869_v14 = vld [vmem:[%s1132_s3 + $0x28] sm:$0xff]  }
 0x255   :  { %v322_v45 = vadd.f32 %v321_v36, %v310_v40  ;;  %v311_v46 = vadd.f32 %v282_v44, %v164_v16  ;;  %812 = vmatprep.subr.bf16.mxu0 %v868_v13  ;;  %v871_v16 = vld [vmem:[%s1132_s3 + $0x38] sm:$0xff]   ;;  %v458_v40 = vrot.slane %v1025_v35, %v457_v39  ;;  %s929_s3 = smov [#allocation2]  }
 0x256   :  { %v325_v47 = vadd.f32 %v321_v36, %v313_v43  ;;  %v332_v49 = vmax.f32 %v324_v42, 0.0  ;;  %s665_s15 = sshll.u32 %s929_s3, 4  ;;  %s666_s15 = int_to_ptr.vmem [resolvable:$true] %s665_s15 }
 0x257   :  { %v323_v48 = vadd.f32 %v321_v36, %v311_v46  ;;  %v330_v51 = vmax.f32 %v322_v45, 0.0  ;;  %s904_s16 = scalar_lea.vmem %s666_s15, 1024  ;;  %p909_p1 = scmp.lt.s32.totalorder %s666_s15, %s666_s15 }
 0x258   :  { %v333_v50 = vmax.f32 %v325_v47, 0.0  ;;  %813 = vmatpush3.bf16.msra.mxu0 %v868_v13  ;;  %p905_p0 = scmp.ne.s32.totalorder %s666_s15, %s904_s16  ;;  %p910_p2 = scmp.lt.s32.totalorder %s904_s16, %s904_s16 }
 0x259   :  { %v331_v52 = vmax.f32 %v323_v48, 0.0  ;;  %v786_v53 = vpop.f32.mrb[4].mxu1  ;;  %814 = vmatprep.subr.bf16.mxu0 %v869_v14 }
 0x25a   :  { %v316_v54 = vadd.f32 %v786_v53, %v770_v19  ;;  %v295_v55 = vpop.f32.mrb[5].mxu1  ;;  %v1028_v56 = vpack.c.bf16 %v333_v50, %v332_v49  ;;  %p911_p3 = por %p910_p2, %p909_p1 }
 0x25b   :  { %v314_v57 = vadd.f32 %v295_v55, %v177_v20  ;;  %v787_v58 = vpop.f32.mrb[6].mxu1  ;;  %v1030_v59 = vpack.c.bf16 %v331_v52, %v330_v51 }
 0x25c   :  { %v328_v60 = vadd.f32 %v321_v36, %v316_v54  ;;  %v317_v61 = vadd.f32 %v787_v58, %v771_v21  ;;  %v298_v62 = vpop.f32.mrb[7].mxu1  ;;  %815 = vmatpush3.bf16.msra.mxu0 %v869_v14  ;;  %p912_p4 = pnand %p911_p3, %p905_p0 }
 0x25d   :  { %v326_v63 = vadd.f32 %v321_v36, %v314_v57  ;;  %v315_v0 = vadd.f32 %v298_v62, %v180_v23  ;;  %788 = vmatprep.subr.bf16.mxu1 %v1030_v59  ;;  %816 = vmatprep.subr.bf16.mxu0 %v870_v15 }
 0x25e   :  { %v329_v1 = vadd.f32 %v321_v36, %v317_v61  ;;  %789 = vmatpush3.bf16.msra.mxu1 %v1030_v59  ;;  %v336_v3 = vmax.f32 %v328_v60, 0.0 }
 0x25f   :  { %v327_v2 = vadd.f32 %v321_v36, %v315_v0  ;;  %790 = vmatprep.subr.bf16.mxu1 %v1028_v56  ;;  %v334_v5 = vmax.f32 %v326_v63, 0.0 }
 0x260   :  { %v337_v4 = vmax.f32 %v329_v1, 0.0  ;;  %817 = vmatpush3.bf16.msra.mxu0 %v870_v15 }
 0x261   :  { %v335_v6 = vmax.f32 %v327_v2, 0.0  ;;  %818 = vmatprep.subr.bf16.mxu0 %v871_v16 }
 0x262   :  { %791 = vmatpush3.bf16.msra.mxu1 %v1028_v56  ;;  %v1036_v7 = vpack.c.bf16 %v337_v4, %v336_v3 }
 0x263   :  { %v1038_v8 = vpack.c.bf16 %v335_v6, %v334_v5 }
 0x264   :  { %819 = vmatpush3.bf16.msra.mxu0 %v871_v16 }
 0x265   :  { %792 = vmatprep.subr.bf16.mxu1 %v1038_v8 }
 0x266   :  { %793 = vmatpush3.bf16.msra.mxu1 %v1038_v8 }
 0x267   :  { %794 = vmatprep.subr.bf16.mxu1 %v1036_v7 }
 0x26a   :  { %795 = vmatpush3.bf16.msra.mxu1 %v1036_v7 }
 0x26b   :  { %828 = vmatprep.subr.bf16.mxu1 %v864_v9 }
 0x26d   :  { %797 = vmatmul.mubr.msk.bf16.vlgmr.msra.gmra.mrb[8].mxu1 %vm232_vm0, %v861_v29 }
 0x26e   :  { %800 = vmatprep.mubr.msk.bf16.mxu1 %vm232_vm0, %v862_v30  ;;  %836 = vmatpush3.bf16.msra.mxu1 %v864_v9 }
 0x26f   :  { %829 = vmatprep.subr.bf16.mxu1 %v865_v10 }
 0x272   :  { %837 = vmatpush3.bf16.msra.mxu1 %v865_v10 }
 0x273   :  { %830 = vmatprep.subr.bf16.mxu1 %v866_v11 }
 0x275   :  { %801 = vmatmul.mubr.msk.bf16.gmra.mrb[12].mxu1 %vm232_vm0, %v863_v31 }
 0x276   :  { %838 = vmatpush3.bf16.msra.mxu1 %v866_v11 }
 0x277   :  { %831 = vmatprep.subr.bf16.mxu1 %v867_v12 }
 0x27a   :  { %839 = vmatpush3.bf16.msra.mxu1 %v867_v12 }
 0x27b   :  { %832 = vmatprep.subr.bf16.mxu1 %v868_v13 }
 0x27e   :  { %840 = vmatpush3.bf16.msra.mxu1 %v868_v13 }
 0x27f   :  { %833 = vmatprep.subr.bf16.mxu1 %v869_v14 }
 0x282   :  { %841 = vmatpush3.bf16.msra.mxu1 %v869_v14 }
 0x283   :  { %834 = vmatprep.subr.bf16.mxu1 %v870_v15 }
 0x286   :  { %842 = vmatpush3.bf16.msra.mxu1 %v870_v15 }
 0x287   :  { %835 = vmatprep.subr.bf16.mxu1 %v871_v16 }
 0x28a   :  { %843 = vmatpush3.bf16.msra.mxu1 %v871_v16 }
 0x340   :  { %v798_v17 = vpop.f32.mrb[8].mxu1 }
 0x341   :  { %v376_v18 = vpop.f32.mrb[9].mxu1 }
 0x342   :  { %v799_v19 = vpop.f32.mrb[10].mxu1 }
 0x343   :  { %v408_v20 = vpack.c.bf16 %v799_v19, %v798_v17  ;;  %v379_v21 = vpop.f32.mrb[11].mxu1 }
 0x344   :  { %v407_v22 = vpack.c.bf16 %v379_v21, %v376_v18 }
 0x346   :  { %415 = vrot.lane.b32.xlu0 %v407_v22, %s928_s2 }
 0x348   :  { %v802_v23 = vpop.f32.mrb[12].mxu1 }
 0x349   :  { %v392_v24 = vpop.f32.mrb[13].mxu1 }
 0x34a   :  { %417 = vrot.lane.b32.xlu0 %v408_v20, %s928_s2  ;;  %v803_v25 = vpop.f32.mrb[14].mxu1 }
 0x34b   :  { %v410_v26 = vpack.c.bf16 %v803_v25, %v802_v23  ;;  %v395_v27 = vpop.f32.mrb[15].mxu1 }
 0x34c   :  { %v409_v28 = vpack.c.bf16 %v395_v27, %v392_v24 }
 0x34e   :  { %419 = vrot.lane.b32.xlu1 %v409_v28, %s928_s2 }
 0x352   :  { %421 = vrot.lane.b32.xlu1 %v410_v26, %s928_s2 }
 0x3b8   :  { %v416_v29 = vpop.permute.xlu0 %415 }
 0x3b9   :  { %v425_v30 = vsel %vm232_vm0, %v1030_v59, %v416_v29 }
 0x3ba   :  { %820 = vmatprep.mubr.bf16.mxu0 %v425_v30 }
 0x3bc   :  { %v418_v31 = vpop.permute.xlu0 %417 }
 0x3bd   :  { %v429_v32 = vsel %vm232_vm0, %v1028_v56, %v418_v31 }
 0x3be   :  { %821 = vmatmul.mubr.bf16.vlgmr.msra.gmra.mrb[8].mxu0 %v429_v32 }
 0x3c0   :  { %v420_v34 = vpop.permute.xlu1 %419 }
 0x3c1   :  { %v433_v36 = vsel %vm232_vm0, %v1038_v8, %v420_v34 }
 0x3c2   :  { %824 = vmatprep.mubr.bf16.mxu1 %v433_v36 }
 0x3c4   :  { %v422_v37 = vpop.permute.xlu1 %421 }
 0x3c5   :  { %v437_v38 = vsel %vm232_vm0, %v1036_v7, %v422_v37 }
 0x3c6   :  { %825 = vmatmul.mubr.bf16.vlgmr.msra.gmra.mrb[16].mxu1 %v437_v38 }
 0x491   :  { %v822_v41 = vpop.f32.mrb[8].mxu0 }
 0x492   :  { %v550_v42 = vadd.f32 %v822_v41, %v458_v40  ;;  %v541_v43 = vpop.f32.mrb[9].mxu0 }
 0x493   :  { %v823_v44 = vpop.f32.mrb[10].mxu0  ;;  %v542_v47 = vadd.f32 %v541_v43, %v458_v40 }
 0x494   :  { %576 = vmax.xlane.f32.xlu0 %v550_v42  ;;  %v544_v45 = vpop.f32.mrb[11].mxu0  ;;  %v553_v49 = vadd.f32 %v823_v44, %v458_v40 }
 0x495   :  { %v545_v46 = vadd.f32 %v544_v45, %v458_v40 }
 0x497   :  { %574 = vmax.xlane.f32.xlu1 %v545_v46 }
 0x498   :  { %572 = vmax.xlane.f32.xlu0 %v542_v47 }
 0x499   :  { %v826_v48 = vpop.f32.mrb[16].mxu1 }
 0x49a   :  { %v557_v50 = vpop.f32.mrb[17].mxu1  ;;  %v566_v35 = vadd.f32 %v826_v48, %v458_v40 }
 0x49b   :  { %v558_v51 = vadd.f32 %v557_v50, %v458_v40  ;;  %v827_v52 = vpop.f32.mrb[18].mxu1 }
 0x49c   :  { %578 = vmax.xlane.f32.xlu0 %v553_v49  ;;  %v560_v53 = vpop.f32.mrb[19].mxu1  ;;  %v569_v54 = vadd.f32 %v827_v52, %v458_v40 }
 0x49d   :  { %v561_v33 = vadd.f32 %v560_v53, %v458_v40  ;;  %580 = vmax.xlane.f32.xlu1 %v558_v51 }
 0x4a0   :  { %582 = vmax.xlane.f32.xlu0 %v561_v33 }
 0x4a1   :  { %584 = vmax.xlane.f32.xlu1 %v566_v35 }
 0x4a4   :  { %586 = vmax.xlane.f32.xlu0 %v569_v54 }
 0x521   :  { %v577_v55 = vpop.xlane.xlu0 %576 }
 0x522   :  { %v1085_v56 = vsub.f32 %v550_v42, %v577_v55 }
 0x524   :  { %v600_v57 = vmul.f32 1.442695, %v1085_v56  ;;  %v575_v59 = vpop.xlane.xlu1 %574 }
 0x525   :  { %v573_v58 = vpop.xlane.xlu0 %572  ;;  %v1091_v63 = vsub.f32 %v545_v46, %v575_v59 }
 0x526   :  { %872 = vpow2.f32 %v600_v57  ;;  %v1088_v60 = vsub.f32 %v542_v47, %v573_v58 }
 0x527   :  { %v598_v6 = vmul.f32 1.442695, %v1091_v63 }
 0x528   :  { %v596_v61 = vmul.f32 1.442695, %v1088_v60 }
 0x529   :  { %v579_v62 = vpop.xlane.xlu0 %578 }
 0x52a   :  { %874 = vpow2.f32 %v596_v61  ;;  %v1093_v0 = vsub.f32 %v553_v49, %v579_v62  ;;  %v581_v1 = vpop.xlane.xlu1 %580 }
 0x52b   :  { %v1095_v2 = vsub.f32 %v558_v51, %v581_v1 }
 0x52c   :  { %v602_v3 = vmul.f32 1.442695, %v1093_v0 }
 0x52d   :  { %v604_v4 = vmul.f32 1.442695, %v1095_v2  ;;  %v583_v5 = vpop.xlane.xlu0 %582 }
 0x52e   :  { %876 = vpow2.f32 %v602_v3  ;;  %v1100_v7 = vsub.f32 %v561_v33, %v583_v5  ;;  %v585_v8 = vpop.xlane.xlu1 %584 }
 0x52f   :  { %878 = vpow2.f32 %v604_v4  ;;  %v1102_v9 = vsub.f32 %v566_v35, %v585_v8 }
 0x530   :  { %v873_v10 = vpop.eup %872  ;;  %880 = vpow2.f32 %v598_v6  ;;  %v606_v13 = vmul.f32 1.442695, %v1100_v7 }
 0x531   :  { %v608_v11 = vmul.f32 1.442695, %v1102_v9  ;;  %v587_v12 = vpop.xlane.xlu0 %586  ;;  %616 = vadd.xlane.f32.xlu1 %v873_v10 }
 0x532   :  { %v1106_v14 = vsub.f32 %v569_v54, %v587_v12 }
 0x533   :  { %882 = vpow2.f32 %v608_v11 }
 0x534   :  { %v875_v15 = vpop.eup %874  ;;  %884 = vpow2.f32 %v606_v13  ;;  %v610_v16 = vmul.f32 1.442695, %v1106_v14 }
 0x535   :  { %612 = vadd.xlane.f32.xlu1 %v875_v15 }
 0x536   :  { %886 = vpow2.f32 %v610_v16 }
 0x538   :  { %v877_v17 = vpop.eup %876 }
 0x539   :  { %v879_v18 = vpop.eup %878  ;;  %618 = vadd.xlane.f32.xlu0 %v877_v17 }
 0x53a   :  { %620 = vadd.xlane.f32.xlu1 %v879_v18  ;;  %v881_v19 = vpop.eup %880 }
 0x53d   :  { %v883_v20 = vpop.eup %882  ;;  %614 = vadd.xlane.f32.xlu0 %v881_v19 }
 0x53e   :  { %624 = vadd.xlane.f32.xlu1 %v883_v20  ;;  %v885_v21 = vpop.eup %884 }
 0x540   :  { %v887_v22 = vpop.eup %886 }
 0x541   :  { %622 = vadd.xlane.f32.xlu0 %v885_v21 }
 0x545   :  { %626 = vadd.xlane.f32.xlu0 %v887_v22 }
 0x5be   :  { %v617_v23 = vpop.xlane.xlu1 %616 }
 0x5bf   :  { %888 = vlog2.f32 %v617_v23 }
 0x5c2   :  { %v613_v24 = vpop.xlane.xlu1 %612 }
 0x5c3   :  { %890 = vlog2.f32 %v613_v24 }
 0x5c6   :  { %v619_v25 = vpop.xlane.xlu0 %618 }
 0x5c7   :  { %892 = vlog2.f32 %v619_v25  ;;  %v621_v26 = vpop.xlane.xlu1 %620 }
 0x5c8   :  { %894 = vlog2.f32 %v621_v26 }
 0x5c9   :  { %v889_v27 = vpop.eup %888 }
 0x5ca   :  { %v633_v28 = vmul.f32 0.6931472, %v889_v27  ;;  %v615_v29 = vpop.xlane.xlu0 %614 }
 0x5cb   :  { %896 = vlog2.f32 %v615_v29  ;;  %v625_v30 = vpop.xlane.xlu1 %624 }
 0x5cc   :  { %v646_v31 = vsub.f32 %v1085_v56, %v633_v28  ;;  %898 = vlog2.f32 %v625_v30 }
 0x5cd   :  { %v891_v32 = vpop.eup %890 }
 0x5ce   :  { %654 = vst [vmem:[#allocation2 + $0x10] sm:$0xff] %v646_v31  ;;  %v629_v34 = vmul.f32 0.6931472, %v891_v32  ;;  %v623_v36 = vpop.xlane.xlu0 %622 }
 0x5cf   :  { %900 = vlog2.f32 %v623_v36 }
 0x5d0   :  { %v644_v37 = vsub.f32 %v1088_v60, %v629_v34 }
 0x5d1   :  { %v893_v38 = vpop.eup %892 }
 0x5d2   :  { %v895_v39 = vpop.eup %894  ;;  %652 = vst [vmem:[#allocation2] sm:$0xff] %v644_v37  ;;  %v635_v40 = vmul.f32 0.6931472, %v893_v38  ;;  %v627_v41 = vpop.xlane.xlu0 %626 }
 0x5d3   :  { %v637_v42 = vmul.f32 0.6931472, %v895_v39  ;;  %902 = vlog2.f32 %v627_v41 }
 0x5d4   :  { %v647_v43 = vsub.f32 %v1093_v0, %v635_v40 }
 0x5d5   :  { %v897_v44 = vpop.eup %896  ;;  %v648_v45 = vsub.f32 %v1095_v2, %v637_v42 }
 0x5d6   :  { %v899_v46 = vpop.eup %898  ;;  %655 = vst [vmem:[#allocation2 + $0x18] sm:$0xff] %v647_v43  ;;  %v631_v47 = vmul.f32 0.6931472, %v897_v44 }
 0x5d7   :  { %656 = vst [vmem:[#allocation2 + $0x20] sm:$0xff] %v648_v45  ;;  %v641_v48 = vmul.f32 0.6931472, %v899_v46 }
 0x5d8   :  { %v645_v49 = vsub.f32 %v1091_v63, %v631_v47 }
 0x5d9   :  { %v901_v50 = vpop.eup %900  ;;  %v650_v51 = vsub.f32 %v1102_v9, %v641_v48 }
 0x5da   :  { %653 = vst [vmem:[#allocation2 + $0x8] sm:$0xff] %v645_v49  ;;  %v639_v52 = vmul.f32 0.6931472, %v901_v50 }
 0x5db   :  { %658 = vst [vmem:[#allocation2 + $0x30] sm:$0xff] %v650_v51 }
 0x5dc   :  { %v649_v53 = vsub.f32 %v1100_v7, %v639_v52 }
 0x5dd   :  { %v903_v33 = vpop.eup %902 }
 0x5de   :  { %657 = vst [vmem:[#allocation2 + $0x28] sm:$0xff] %v649_v53  ;;  %v643_v35 = vmul.f32 0.6931472, %v903_v33 }
 0x5e0   :  { %v651_v54 = vsub.f32 %v1106_v14, %v643_v35 }
 0x5e2   :  { %659 = vst [vmem:[#allocation2 + $0x38] sm:$0xff] %v651_v54 }
 0x5e3   :  { %915 = shalt.err (!%p912_p4)
}
 0x5e4   :  { %s916_s18 = scalar_lea.hbm %s1134_s5, 1024 }
 0x5e5   :  { %p917_p5 = scmp.ne.s32.totalorder %s1134_s5, %s916_s18  ;;  %p920_p6 = scmp.lt.u32.totalorder %s916_s18, %s1134_s5 }
 0x5e7   :  { %p922_p7 = pnand %p920_p6, %p917_p5 }
 0x5e9   :  { %925 = shalt.err (!%p922_p7)
}
 0x5ea   :  { %s930_s22 = smov 128   ;;  %s931_s23 = smov 8  }
 0x5eb   :  { %671 = dma.vmem_to_hbm [thread:$0]  %s666_s15, 1024, %s1134_s5, [#allocation3], %s930_s22, %s930_s22, %s931_s23  }
 0x5ec   :  { %926 = dma.done.wait [#allocation3], 1024  }
 0x5ed   :  { %927 = vsyncadd [#allocation3], 4294966272 }
 0x5ee   :  { %675 = vsyncpa [#allocation3], 1 }

</bundles_post_ra>
